<compile_context>
chip_gen: v7x
topology: tpu7x:2x2x1
jax: 0.10.0
libtpu: 0.0.40
codegen_flags: <defaults>
</compile_context>

<pallas_src>
import functools

import jax
import jax.numpy as jnp
from jax import lax
from jax.experimental import pallas as pl
from jax.experimental.pallas import tpu as pltpu


def _round_up(x, m):
    return (x + m - 1) // m * m


def _l2_normalize(x, eps=1e-12):
    # torch.nn.functional.normalize(x, dim=-1): x / max(||x||_2, eps)
    sumsq = jnp.sum(x * x, axis=-1, keepdims=True)
    return x * lax.rsqrt(jnp.maximum(sumsq, eps * eps))


def _infonce_kernel_fixed(qn_ref, knT_ref, bias_ref, poslog_ref, loss_ref,
                          l_ref, *, m_const):
    """Fixed-max online sum-of-exp (valid when |logit| <= m_const)."""
    j = pl.program_id(1)

    @pl.when(j == 0)
    def _init():
        # Seed with the positive column: exp(pos_logit - m).
        l_ref[...] = jnp.exp(poslog_ref[...] - m_const)

    # (nb, mb) negative logits; 1/T already folded into qn, bank already
    # normalized + transposed in the wrapper -> plain MXU matmul.
    neg = jnp.dot(qn_ref[...], knT_ref[...],
                  preferred_element_type=jnp.float32)
    # bias = -m for valid columns, -1e30 for padded columns.
    l_ref[...] += jnp.sum(jnp.exp(neg + bias_ref[...]),
                          axis=-1, keepdims=True)

    @pl.when(j == pl.num_programs(1) - 1)
    def _finalize():
        # per-row loss = logsumexp([pos, negatives]) - pos
        loss_ref[...] = (m_const + jnp.log(l_ref[...])) - poslog_ref[...]


def _infonce_kernel_online(qn_ref, knT_ref, bias_ref, poslog_ref, loss_ref,
                           m_ref, l_ref):
    """Flash-style online logsumexp (fallback for very small temperature)."""
    j = pl.program_id(1)

    @pl.when(j == 0)
    def _init():
        m_ref[...] = poslog_ref[...]
        l_ref[...] = jnp.ones_like(l_ref)

    neg = jnp.dot(qn_ref[...], knT_ref[...],
                  preferred_element_type=jnp.float32) + bias_ref[...]
    m_prev = m_ref[...]
    m_new = jnp.maximum(m_prev, jnp.max(neg, axis=-1, keepdims=True))
    alpha = jnp.exp(m_prev - m_new)
    l_ref[...] = alpha * l_ref[...] + jnp.sum(jnp.exp(neg - m_new),
                                              axis=-1, keepdims=True)
    m_ref[...] = m_new

    @pl.when(j == pl.num_programs(1) - 1)
    def _finalize():
        loss_ref[...] = (m_ref[...] + jnp.log(l_ref[...])) - poslog_ref[...]


def info_nce_pallas(query, positive_key, negative_keys, temperature=0.1,
                    reduction='mean', n_blk=None, m_blk=None,
                    mxu_dtype=jnp.bfloat16):
    """Unpaired InfoNCE via a tiled Pallas kernel.

    mxu_dtype: dtype the matmul operands are streamed/fed to the MXU in
      (default bf16, f32 accumulation; softmax math stays f32). Pass None for
      exact f32 logits.
    n_blk / m_blk: query-row / negative-column tile sizes; auto-picked and
      VMEM-budgeted from D if None.
    """
    N, D = query.shape
    M, Dk = negative_keys.shape
    assert positive_key.shape == (N, D) and Dk == D

    f32 = jnp.float32
    inv_t = 1.0 / float(temperature)
    # Unit-norm vectors => |logit| <= 1/T; use the constant bound unless T is
    # so small that exp(logit - 1/T) could underflow badly.
    use_fixed_max = float(temperature) >= 0.02
    m_const = inv_t

    # ---- hoisted, exact f32 preprocessing (done once in XLA) -------------
    qn = _l2_normalize(query.astype(f32)) * inv_t          # (N, D), carries 1/T
    pn = _l2_normalize(positive_key.astype(f32))
    kn = _l2_normalize(negative_keys.astype(f32))
    pos_logit = jnp.sum(qn * pn, axis=-1, keepdims=True)    # (N, 1), already /T

    # Zero-pad D to a lane multiple (exact: zero columns don't change dots).
    Dp = _round_up(max(D, 128), 128)
    if Dp != D:
        qn = jnp.pad(qn, ((0, 0), (0, Dp - D)))
        kn = jnp.pad(kn, ((0, 0), (0, Dp - D)))

    # ---- tile sizes with a VMEM budget ------------------------------------
    if n_blk is None:
        n_blk = min(_round_up(N, 8), 256)
    if m_blk is None:
        m_blk = min(_round_up(M, 128), 512)
    n_blk = max(_round_up(n_blk, 8), 8)
    m_blk = max(_round_up(m_blk, 128), 128)

    stream_dtype = f32 if mxu_dtype is None else mxu_dtype
    eb = jnp.dtype(stream_dtype).itemsize

    def vmem_est(nb, mb):
        return (2 * nb * Dp * eb          # qn tile (double-buffered)
                + 2 * Dp * mb * eb        # key-bank tile (double-buffered)
                + 2 * 8 * mb * 4          # bias tile (sublane-padded)
                + 6 * nb * 128 * 4        # pos_logit / out / accumulators
                + 4 * nb * mb * 4)        # f32 logits / exp temporaries

    budget = 36 << 20   # keep well under the scoped limit we set below
    while vmem_est(n_blk, m_blk) > budget and m_blk > 128:
        m_blk //= 2      # shrink the streamed bank first (cheap to re-stream)
    while vmem_est(n_blk, m_blk) > budget and n_blk > 8:
        n_blk = max(_round_up(n_blk // 2, 8), 8)

    Np = _round_up(N, n_blk)
    Mp = _round_up(M, m_blk)
    if Np != N:
        qn = jnp.pad(qn, ((0, Np - N), (0, 0)))
        pos_logit = jnp.pad(pos_logit, ((0, Np - N), (0, 0)))
    if Mp != M:
        kn = jnp.pad(kn, ((0, Mp - M), (0, 0)))

    # Pre-transpose the (already normalized) bank so the kernel matmul is a
    # standard (nb, K) x (K, mb) — no in-kernel transpose on the XLU.
    knT = kn.T                                               # (Dp, Mp)
    qn_s = qn.astype(stream_dtype)
    knT_s = knT.astype(stream_dtype)

    # Additive padding bias: 0 for valid columns, -1e30 for padded columns;
    # the fixed-max constant is folded in so the kernel does a single add.
    col = jnp.arange(Mp)
    bias = jnp.where(col < M, 0.0, -1e30).astype(f32)[None, :]   # (1, Mp)
    if use_fixed_max:
        bias = bias - m_const

    grid = (Np // n_blk, Mp // m_blk)

    if use_fixed_max:
        kernel = functools.partial(_infonce_kernel_fixed, m_const=m_const)
        scratch = [pltpu.VMEM((n_blk, 1), f32)]                  # running sum
    else:
        kernel = _infonce_kernel_online
        scratch = [pltpu.VMEM((n_blk, 1), f32),                  # running max
                   pltpu.VMEM((n_blk, 1), f32)]                  # running sum

    vmem_limit = int(min(max(vmem_est(n_blk, m_blk) * 3 // 2, 32 << 20),
                         48 << 20))

    per_row = pl.pallas_call(
        kernel,
        out_shape=jax.ShapeDtypeStruct((Np, 1), f32),
        grid_spec=pltpu.PrefetchScalarGridSpec(
            num_scalar_prefetch=0,
            grid=grid,
            in_specs=[
                # normalized, 1/T-scaled query tile: constant over j.
                pl.BlockSpec((n_blk, Dp), lambda i, j: (i, 0)),
                # normalized, transposed key bank: streamed along j.
                pl.BlockSpec((Dp, m_blk), lambda i, j: (0, j)),
                # padding bias row: streamed along j.
                pl.BlockSpec((1, m_blk), lambda i, j: (0, j)),
                # positive logit column: constant over j.
                pl.BlockSpec((n_blk, 1), lambda i, j: (i, 0)),
            ],
            out_specs=pl.BlockSpec((n_blk, 1), lambda i, j: (i, 0)),
            scratch_shapes=scratch),
        compiler_params=pltpu.CompilerParams(
            dimension_semantics=("parallel", "arbitrary"),
            vmem_limit_bytes=vmem_limit),
    )(qn_s, knT_s, bias, pos_logit)

    per_row = per_row[:N, 0]
    if reduction == 'mean':
        return jnp.mean(per_row)
    if reduction == 'sum':
        return jnp.sum(per_row)
    return per_row


def infonce_forward(query, positive_key, temperature=0.1, reduction='mean',
                    **kwargs):
    """InfoNCE(temperature).forward given the two (N, D) embeddings: the
    negatives are the positive keys themselves (unpaired mode)."""
    return info_nce_pallas(query, positive_key, positive_key,
                           temperature=temperature, reduction=reduction,
                           **kwargs)


def _reference_rows(query, positive_key, negative_keys, temperature=0.1):
    # Pure-JAX mirror of the PyTorch static method (unpaired), per-row loss.
    q = _l2_normalize(query.astype(jnp.float32))
    p = _l2_normalize(positive_key.astype(jnp.float32))
    k = _l2_normalize(negative_keys.astype(jnp.float32))
    pos = jnp.sum(q * p, axis=-1, keepdims=True)
    neg = q @ k.T
    logits = jnp.concatenate([pos, neg], axis=1) / temperature
    return jax.nn.logsumexp(logits, axis=-1) - logits[:, 0]


def _reference(query, positive_key, negative_keys, temperature=0.1):
    return jnp.mean(_reference_rows(query, positive_key, negative_keys,
                                    temperature))


if __name__ == "__main__":
    key = jax.random.PRNGKey(0)

    # 1) Shapes implied by the module's forward (small batch of embeddings),
    #    default bf16 MXU path -> loose tolerance.
    kq, kp = jax.random.split(key)
    N, D = 8, 32
    query = jax.random.normal(kq, (N, D), dtype=jnp.float32)
    positive_key = jax.random.normal(kp, (N, D), dtype=jnp.float32)
    ref = _reference(query, positive_key, positive_key, 0.1)
    loss = jax.block_until_ready(infonce_forward(query, positive_key, 0.1))
    assert jnp.allclose(loss, ref, rtol=5e-2, atol=1e-1), (loss, ref)

    # 1b) Same inputs, exact f32 path -> tight tolerance.
    loss_f32 = jax.block_until_ready(
        infonce_forward(query, positive_key, 0.1, mxu_dtype=None))
    assert jnp.allclose(loss_f32, ref, rtol=1e-4, atol=1e-4), (loss_f32, ref)

    # 2) Docstring-style explicit negative bank (D already lane-sized), f32.
    k1, k2, k3 = jax.random.split(jax.random.PRNGKey(1), 3)
    q2 = jax.random.normal(k1, (32, 128), dtype=jnp.float32)
    p2 = jax.random.normal(k2, (32, 128), dtype=jnp.float32)
    n2 = jax.random.normal(k3, (48, 128), dtype=jnp.float32)
    l2 = jax.block_until_ready(
        info_nce_pallas(q2, p2, n2, temperature=0.1, mxu_dtype=None))
    assert jnp.allclose(l2, _reference(q2, p2, n2, 0.1), rtol=1e-4, atol=1e-4)

    # 3) Multi-tile grid + padded/masked negatives, f32, plus 'none' reduction.
    k4, k5, k6 = jax.random.split(jax.random.PRNGKey(2), 3)
    q3 = jax.random.normal(k4, (10, 48), dtype=jnp.float32)
    p3 = jax.random.normal(k5, (10, 48), dtype=jnp.float32)
    n3 = jax.random.normal(k6, (300, 48), dtype=jnp.float32)
    rows = jax.block_until_ready(
        info_nce_pallas(q3, p3, n3, temperature=0.1, reduction='none',
                        n_blk=8, m_blk=128, mxu_dtype=None))
    ref_rows = _reference_rows(q3, p3, n3, 0.1)
    assert jnp.allclose(rows, ref_rows, rtol=1e-4, atol=1e-4)

    # 3b) Same multi-tile problem on the default bf16 MXU path.
    l3b = jax.block_until_ready(
        info_nce_pallas(q3, p3, n3, temperature=0.1, n_blk=8, m_blk=128))
    assert jnp.allclose(l3b, _reference(q3, p3, n3, 0.1),
                        rtol=5e-2, atol=1e-1), l3b

    # 4) Tiny temperature -> online-max fallback kernel, f32.
    l4 = jax.block_until_ready(
        info_nce_pallas(q3, p3, n3, temperature=0.01, n_blk=8, m_blk=128,
                        mxu_dtype=None))
    assert jnp.allclose(l4, _reference(q3, p3, n3, 0.01), rtol=1e-4, atol=1e-3)

    print("KERNEL_OK")
</pallas_src>

<mosaic_0001>
module attributes {stable_mosaic.version = 11 : i64} {
  func.func @_infonce_kernel_fixed(%arg0: i32, %arg1: i32, %arg2: memref<8x128xbf16, #tpu.memory_space<vmem>>, %arg3: memref<128x128xbf16, #tpu.memory_space<vmem>>, %arg4: memref<1x128xf32, #tpu.memory_space<vmem>>, %arg5: memref<8x1xf32, #tpu.memory_space<vmem>>, %arg6: memref<8x1xf32, #tpu.memory_space<vmem>>, %arg7: memref<8x1xf32, #tpu.memory_space<vmem>>) attributes {dimension_semantics = [#tpu.dimension_semantics<parallel>, #tpu.dimension_semantics<arbitrary>], iteration_bounds = array<i64: 1, 1>, scalar_prefetch = 0 : i64, scratch_operands = 1 : i64, tpu.core_type = #tpu.core_type<tc>, window_params = [{transform_indices = @transform_0, window_bounds = array<i64: 8, 128>}, {transform_indices = @transform_1, window_bounds = array<i64: 128, 128>}, {transform_indices = @transform_2, window_bounds = array<i64: 1, 128>}, {transform_indices = @transform_3, window_bounds = array<i64: 8, 1>}, {transform_indices = @transform_4, window_bounds = array<i64: 8, 1>}]} {
    %c0_i32 = arith.constant 0 : i32
    %0 = arith.cmpi eq, %arg1, %c0_i32 : i32
    %1 = arith.extui %0 : i1 to i32
    %c0_i32_0 = arith.constant 0 : i32
    %2 = arith.cmpi ne, %1, %c0_i32_0 : i32
    scf.if %2 {
      %c0_13 = arith.constant 0 : index
      %c0_14 = arith.constant 0 : index
      %18 = vector.load %arg5[%c0_13, %c0_14] : memref<8x1xf32, #tpu.memory_space<vmem>>, vector<8x1xf32>
      %cst_15 = arith.constant 1.000000e+01 : f32
      %19 = vector.broadcast %cst_15 : f32 to vector<8x1xf32>
      %20 = arith.subf %18, %19 : vector<8x1xf32>
      %21 = math.exp %20 : vector<8x1xf32>
      %c0_16 = arith.constant 0 : index
      %c0_17 = arith.constant 0 : index
      %22 = vector.load %arg7[%c0_16, %c0_17] : memref<8x1xf32, #tpu.memory_space<vmem>>, vector<8x1xf32>
      tpu.vector_store %arg7[%c0_16, %c0_17], %21 {strides = array<i32>} : memref<8x1xf32, #tpu.memory_space<vmem>>, vector<8x1xf32>,
    } else {
    }
    %c0 = arith.constant 0 : index
    %c0_1 = arith.constant 0 : index
    %3 = vector.load %arg2[%c0, %c0_1] : memref<8x128xbf16, #tpu.memory_space<vmem>>, vector<8x128xbf16>
    %c0_2 = arith.constant 0 : index
    %c0_3 = arith.constant 0 : index
    %4 = vector.load %arg3[%c0_2, %c0_3] : memref<128x128xbf16, #tpu.memory_space<vmem>>, vector<128x128xbf16>
    %cst = arith.constant dense<0.000000e+00> : vector<8x128xf32>
    %5 = tpu.matmul %3, %4, %cst {dimension_numbers = #tpu.dot_dimension_numbers<[1], [0], [0], [1], [0, 0, 1, 1], [], []>} : vector<8x128xbf16>, vector<128x128xbf16>, vector<8x128xf32> -> vector<8x128xf32>
    %c0_4 = arith.constant 0 : index
    %c0_5 = arith.constant 0 : index
    %6 = vector.load %arg7[%c0_4, %c0_5] : memref<8x1xf32, #tpu.memory_space<vmem>>, vector<8x1xf32>
    %c0_6 = arith.constant 0 : index
    %c0_7 = arith.constant 0 : index
    %7 = vector.load %arg4[%c0_6, %c0_7] : memref<1x128xf32, #tpu.memory_space<vmem>>, vector<1x128xf32>
    %8 = vector.broadcast %7 : vector<1x128xf32> to vector<8x128xf32>
    %9 = arith.addf %5, %8 : vector<8x128xf32>
    %10 = math.exp %9 : vector<8x128xf32>
    %cst_8 = arith.constant dense<0.000000e+00> : vector<8xf32>
    %11 = vector.multi_reduction <add>, %10, %cst_8 [1] : vector<8x128xf32> to vector<8xf32>
    %12 = vector.shape_cast %11 : vector<8xf32> to vector<8x1xf32>
    %13 = arith.addf %6, %12 : vector<8x1xf32>
    %c0_9 = arith.constant 0 : index
    %c0_10 = arith.constant 0 : index
    %14 = vector.load %arg7[%c0_9, %c0_10] : memref<8x1xf32, #tpu.memory_space<vmem>>, vector<8x1xf32>
    tpu.vector_store %arg7[%c0_9, %c0_10], %13 {strides = array<i32>} : memref<8x1xf32, #tpu.memory_space<vmem>>, vector<8x1xf32>,
    %c0_i32_11 = arith.constant 0 : i32
    %15 = arith.cmpi eq, %arg1, %c0_i32_11 : i32
    %16 = arith.extui %15 : i1 to i32
    %c0_i32_12 = arith.constant 0 : i32
    %17 = arith.cmpi ne, %16, %c0_i32_12 : i32
    scf.if %17 {
      %c0_13 = arith.constant 0 : index
      %c0_14 = arith.constant 0 : index
      %18 = vector.load %arg7[%c0_13, %c0_14] : memref<8x1xf32, #tpu.memory_space<vmem>>, vector<8x1xf32>
      %19 = math.log %18 : vector<8x1xf32>
      %cst_15 = arith.constant 1.000000e+01 : f32
      %20 = vector.broadcast %cst_15 : f32 to vector<8x1xf32>
      %21 = arith.addf %20, %19 : vector<8x1xf32>
      %c0_16 = arith.constant 0 : index
      %c0_17 = arith.constant 0 : index
      %22 = vector.load %arg5[%c0_16, %c0_17] : memref<8x1xf32, #tpu.memory_space<vmem>>, vector<8x1xf32>
      %23 = arith.subf %21, %22 : vector<8x1xf32>
      %c0_18 = arith.constant 0 : index
      %c0_19 = arith.constant 0 : index
      %24 = vector.load %arg6[%c0_18, %c0_19] : memref<8x1xf32, #tpu.memory_space<vmem>>, vector<8x1xf32>
      tpu.vector_store %arg6[%c0_18, %c0_19], %23 {strides = array<i32>} : memref<8x1xf32, #tpu.memory_space<vmem>>, vector<8x1xf32>,
    } else {
    }
    return
  }
  func.func @transform_0(%arg0: i32, %arg1: i32) -> (i32, i32) {
    %c0_i32 = arith.constant 0 : i32
    %c0_i32_0 = arith.constant 0 : i32
    return %arg0, %c0_i32 : i32, i32
  }
  func.func @transform_1(%arg0: i32, %arg1: i32) -> (i32, i32) {
    %c0_i32 = arith.constant 0 : i32
    %c0_i32_0 = arith.constant 0 : i32
    return %c0_i32, %arg1 : i32, i32
  }
  func.func @transform_2(%arg0: i32, %arg1: i32) -> (i32, i32) {
    %c0_i32 = arith.constant 0 : i32
    %c0_i32_0 = arith.constant 0 : i32
    return %c0_i32, %arg1 : i32, i32
  }
  func.func @transform_3(%arg0: i32, %arg1: i32) -> (i32, i32) {
    %c0_i32 = arith.constant 0 : i32
    %c0_i32_0 = arith.constant 0 : i32
    return %arg0, %c0_i32 : i32, i32
  }
  func.func @transform_4(%arg0: i32, %arg1: i32) -> (i32, i32) {
    %c0_i32 = arith.constant 0 : i32
    %c0_i32_0 = arith.constant 0 : i32
    return %arg0, %c0_i32 : i32, i32
  }
}

</mosaic_0001>

<bundles_post_ra>
// kernel: tpu_custom_call.1
= control target key start
LH: loop header
LB: loop body
LE: loop exit
PB: predicated region body
PF: predicated region fallthrough
CT: control target
= control target key end

     0   :  { %9 = vsyncpa [#allocation4], 0  ;;  %s259_s15 = smov [#allocation3]   ;;  %s316_s0 = inlined_call_operand.vmem [shape: bf16[8,128], index: 0, kind: input, shape index: {}]   ;;  %s317_s1 = inlined_call_operand.hbm [shape: bf16[128,128], index: 1, kind: input, shape index: {}]   ;;  %s318_s2 = inlined_call_operand.vmem [shape: f32[1,128], index: 2, kind: input, shape index: {}]   ;;  %s319_s3 = inlined_call_operand.vmem [shape: f32[8,1], index: 3, kind: input, shape index: {}]   ;;  %s320_s4 = inlined_call_operand.vmem [shape: f32[8,1], index: 4, kind: output, shape index: {}]  }
   0x1   :  { %s17_s16 = sshll.u32 %s259_s15, 4  ;;  %s235_s19 = scalar_lea.hbm %s317_s1, 1024  ;;  %s18_s16 = int_to_ptr.vmem [resolvable:$true] %s17_s16 }
   0x2   :  { %p236_p0 = scmp.ne.s32.totalorder %s317_s1, %s235_s19  ;;  %p239_p1 = scmp.lt.u32.totalorder %s235_s19, %s317_s1 }
   0x4   :  { %p241_p2 = pnand %p239_p1, %p236_p0 }
   0x6   :  { %244 = shalt.err (!%p241_p2)
}
   0x7   :  { %s245_s24 = scalar_lea.vmem %s18_s16, 1024  ;;  %p250_p4 = scmp.lt.s32.totalorder %s18_s16, %s18_s16 }
   0x8   :  { %p246_p3 = scmp.ne.s32.totalorder %s18_s16, %s245_s24  ;;  %p251_p5 = scmp.lt.s32.totalorder %s245_s24, %s245_s24 }
   0xa   :  { %p252_p6 = por %p251_p5, %p250_p4 }
   0xc   :  { %p253_p7 = pnand %p252_p6, %p246_p3 }
   0xe   :  { %256 = shalt.err (!%p253_p7)
}
   0xf   :  { %s260_s25 = smov 64   ;;  %s261_s26 = smov 4  }
  0x10   :  { %23 = dma.hbm_to_vmem [thread:$0]  %s317_s1, 1024, %s18_s16, [#allocation4], %s260_s25, %s260_s25, %s261_s26  }
  0x11   :  { %257 = dma.done.wait [#allocation4], 1024  }
  0x12   :  { %258 = vsyncadd [#allocation4], 4294966272  ;;  %v262_v0 = vmov 0.0   ;;  %vm263_vm0 = vmmov 0   ;;  %v221_v1 = vld [vmem:[#allocation3] sm:$0xff]   ;;  %v222_v2 = vld [vmem:[#allocation3 + $0x8] sm:$0xff]  }
  0x13   :  { %196 = vmatprep.subr.bf16.mxu0 %v262_v0  ;;  %212 = vmatprep.mubr.msk.bf16.mxu0 %vm263_vm0, %v262_v0  ;;  %v223_v3 = vld [vmem:[#allocation3 + $0x10] sm:$0xff]   ;;  %v224_v4 = vld [vmem:[#allocation3 + $0x18] sm:$0xff]   ;;  %v225_v5 = vld [vmem:[#allocation3 + $0x20] sm:$0xff]   ;;  %vm40_vm1 = vcmask 7168  }
  0x14   :  { %197 = vmatpush3.bf16.msra.mxu0 %v221_v1  ;;  %v226_v6 = vld [vmem:[#allocation3 + $0x28] sm:$0xff]   ;;  %v227_v7 = vld [vmem:[#allocation3 + $0x30] sm:$0xff]   ;;  %v228_v8 = vld [vmem:[#allocation3 + $0x38] sm:$0xff]  }
  0x15   :  { %198 = vmatprep.subr.bf16.mxu0 %v262_v0  ;;  %v42_v9 = vld [vmem:[%s316_s0] sm:$0xf] }
  0x16   :  { %v36_v10 = vld [vmem:[%s319_s3] sm:$0xff] }
  0x17   :  { %v177_v11 = vadd.f32 -10.0, %v36_v10  ;;  %v178_v14 = vld [vmem:[%s318_s2] ss:$0 sm:$0xff] }
  0x18   :  { %199 = vmatpush3.bf16.msra.mxu0 %v222_v2 }
  0x19   :  { %200 = vmatprep.subr.bf16.mxu0 %v262_v0  ;;  %v38_v12 = vmul.f32 1.442695, %v177_v11 }
  0x1b   :  { %229 = vpow2.f32 %v38_v12 }
  0x1c   :  { %201 = vmatpush3.bf16.msra.mxu0 %v223_v3 }
  0x1d   :  { %202 = vmatprep.subr.bf16.mxu0 %v262_v0 }
  0x20   :  { %203 = vmatpush3.bf16.msra.mxu0 %v224_v4 }
  0x21   :  { %204 = vmatprep.subr.bf16.mxu0 %v262_v0 }
  0x24   :  { %205 = vmatpush3.bf16.msra.mxu0 %v225_v5 }
  0x25   :  { %206 = vmatprep.subr.bf16.mxu0 %v262_v0  ;;  %v230_v13 = vpop.eup %229 }
  0x26   :  { %41 = vst.msk [vmem:[#allocation2] sm:$0xff] %vm40_vm1, %v230_v13 }
  0x28   :  { %207 = vmatpush3.bf16.msra.mxu0 %v226_v6 }
  0x29   :  { %208 = vmatprep.subr.bf16.mxu0 %v262_v0 }
  0x2c   :  { %209 = vmatpush3.bf16.msra.mxu0 %v227_v7 }
  0x2d   :  { %210 = vmatprep.subr.bf16.mxu0 %v262_v0  ;;  %v59_v22 = vld [vmem:[#allocation2] sm:$0xff] }
  0x30   :  { %211 = vmatpush3.bf16.msra.mxu0 %v228_v8 }
  0x33   :  { %213 = vmatmul.mubr.bf16.vlgmr.msra.gmra.mrb[0].mxu0 %v42_v9 }
 0x106   :  { %v149_v15 = vpop.f32.mrb[0].mxu0 }
 0x107   :  { %v150_v16 = vadd.f32 %v178_v14, %v149_v15  ;;  %v214_v17 = vpop.f32.mrb[1].mxu0 }
 0x108   :  { %v152_v18 = vpop.f32.mrb[2].mxu0 }
 0x109   :  { %v155_v19 = vmul.f32 1.442695, %v150_v16  ;;  %v215_v20 = vpop.f32.mrb[3].mxu0 }
 0x10b   :  { %231 = vpow2.f32 %v155_v19 }
 0x115   :  { %v232_v21 = vpop.eup %231 }
 0x116   :  { %157 = vadd.xlane.f32.xlu0 %v232_v21 }
 0x1a3   :  { %v158_v23 = vpop.xlane.xlu0 %157 }
 0x1a4   :  { %v159_v24 = vadd.f32 %v158_v23, %v59_v22 }
 0x1a6   :  { %161 = vst.msk [vmem:[#allocation2] sm:$0xff] %vm40_vm1, %v159_v24 }
 0x1ad   :  { %v165_v25 = vld [vmem:[#allocation2] sm:$0xff] }
 0x1ae   :  { %233 = vlog2.f32 %v165_v25 }
 0x1b8   :  { %v234_v26 = vpop.eup %233 }
 0x1b9   :  { %v167_v27 = vmul.f32 0.6931472, %v234_v26 }
 0x1bb   :  { %v168_v28 = vadd.f32 10.0, %v167_v27 }
 0x1bd   :  { %v170_v29 = vsub.f32 %v168_v28, %v36_v10 }
 0x1bf   :  { %171 = vst.msk [vmem:[%s320_s4] sm:$0xff] %vm40_vm1, %v170_v29 }
 0x1c0   :  { %176 = vsyncpa [#allocation4], 1 }

</bundles_post_ra>
